<compile_context>
chip_gen: v5e
topology: v5e:2x2
jax: 0.10.0
libtpu: 0.0.40
codegen_flags: <defaults>
</compile_context>

<pallas_src>
import math
import functools
import numpy as np

import jax
import jax.numpy as jnp
from jax.experimental import pallas as pl
from jax.experimental.pallas import tpu as pltpu


# -----------------------------------------------------------------------------
# Kernel
# -----------------------------------------------------------------------------
def _pos_encoding_kernel(x_ref, pe_ref, o_ref):
    """x block (1, TT, Dp) + time-aligned pe block (TT, Dp) -> output block."""
    # TODO(synk): nn.Dropout(p=0.1) in train mode is not applied; identity (eval) semantics.
    o_ref[0] = x_ref[0] + pe_ref[...]


def positional_encoding_forward(x, pe, *, time_tile=256):
    """x: (B, T, D) f32, pe: (max_len, D) f32  ->  (B, T, D) = x + pe[None, :T]."""
    B, T, D = x.shape

    # Pad time (sublane) to a multiple of 8 and features (lane) to a multiple of 128 so
    # every BlockSpec satisfies the (8, 128) tiling constraint and stores are lane-dense.
    Tp = ((T + 7) // 8) * 8
    Dp = ((D + 127) // 128) * 128
    if (Tp, Dp) != (T, D):
        x = jnp.pad(x, ((0, 0), (0, Tp - T), (0, Dp - D)))

    # Only pe[:Tp] is ever read — never broadcast to (B, T, D) in HBM.
    pe_slice = pe[:Tp]
    if Dp != D:
        pe_slice = jnp.pad(pe_slice, ((0, 0), (0, Dp - D)))

    # Time tile: multiple of 8 that divides Tp (Tp is a multiple of 8, so 8 always works).
    TT = min(Tp, ((time_tile + 7) // 8) * 8)
    while Tp % TT:
        TT -= 8
    grid = (Tp // TT, B)   # time outer, batch inner -> pe tile reused across batch steps

    out = pl.pallas_call(
        _pos_encoding_kernel,
        grid=grid,
        in_specs=[
            pl.BlockSpec((1, TT, Dp), lambda t, b: (b, t, 0)),
            # pe index_map ignores the batch axis: one small VMEM-resident tile per time
            # block, no (B, T, D) add stream materialized by XLA.
            pl.BlockSpec((TT, Dp), lambda t, b: (t, 0)),
        ],
        out_specs=pl.BlockSpec((1, TT, Dp), lambda t, b: (b, t, 0)),
        out_shape=jax.ShapeDtypeStruct((B, Tp, Dp), x.dtype),
        compiler_params=pltpu.CompilerParams(
            dimension_semantics=("parallel", "parallel")),
    )(x, pe_slice)

    if (Tp, Dp) != (T, D):
        out = out[:, :T, :D]
    return out


# -----------------------------------------------------------------------------
# Deterministic pe buffer (identical to the PyTorch register_buffer construction)
# -----------------------------------------------------------------------------
def make_positional_encoding(d_model, max_len=1000):
    position = np.arange(max_len, dtype=np.float32)[:, None]
    div_term = np.exp(np.arange(0, d_model, 2, dtype=np.float32)
                      * -(math.log(10000.0) / d_model))
    pe = np.zeros((max_len, d_model), np.float32)
    pe[:, 0::2] = np.sin(position * div_term)
    pe[:, 1::2] = np.cos(position * div_term)
    return jnp.asarray(pe)


# -----------------------------------------------------------------------------
# Main
# -----------------------------------------------------------------------------
if __name__ == "__main__":
    # Small shapes consistent with BIOT's PositionalEncoding usage (d_model = 256).
    B, T, D = 2, 16, 256
    max_len = 1000

    key = jax.random.PRNGKey(0)
    x = jax.random.normal(key, (B, T, D), jnp.float32)
    pe = make_positional_encoding(D, max_len)

    fwd = jax.jit(functools.partial(positional_encoding_forward, time_tile=256))
    out = fwd(x, pe)
    jax.block_until_ready(out)

    # Pure-JAX reference: x + pe[:, :T] (dropout p=0.1 is identity in eval mode).
    ref = x + pe[None, :T, :]
    assert out.shape == (B, T, D), out.shape
    np.testing.assert_allclose(np.asarray(out), np.asarray(ref), rtol=1e-6, atol=1e-6)
    assert bool(jnp.all(jnp.isfinite(out)))
    print("KERNEL_OK")
</pallas_src>

<mosaic_0001>
module attributes {stable_mosaic.version = 11 : i64} {
  func.func @_pos_encoding_kernel(%arg0: i32, %arg1: i32, %arg2: memref<1x16x256xf32, #tpu.memory_space<vmem>>, %arg3: memref<16x256xf32, #tpu.memory_space<vmem>>, %arg4: memref<1x16x256xf32, #tpu.memory_space<vmem>>) attributes {dimension_semantics = [#tpu.dimension_semantics<parallel>, #tpu.dimension_semantics<parallel>], iteration_bounds = array<i64: 1, 2>, scalar_prefetch = 0 : i64, scratch_operands = 0 : i64, tpu.core_type = #tpu.core_type<tc>, window_params = [{transform_indices = @transform_0, window_bounds = array<i64: 1, 16, 256>}, {transform_indices = @transform_1, window_bounds = array<i64: 16, 256>}, {transform_indices = @transform_2, window_bounds = array<i64: 1, 16, 256>}]} {
    %c0 = arith.constant 0 : index
    %c0_0 = arith.constant 0 : index
    %c0_1 = arith.constant 0 : index
    %0 = vector.load %arg2[%c0, %c0_0, %c0_1] : memref<1x16x256xf32, #tpu.memory_space<vmem>>, vector<1x16x256xf32>
    %1 = vector.shape_cast %0 : vector<1x16x256xf32> to vector<16x256xf32>
    %c0_2 = arith.constant 0 : index
    %c0_3 = arith.constant 0 : index
    %2 = vector.load %arg3[%c0_2, %c0_3] : memref<16x256xf32, #tpu.memory_space<vmem>>, vector<16x256xf32>
    %3 = arith.addf %1, %2 : vector<16x256xf32>
    %c0_4 = arith.constant 0 : index
    %c0_5 = arith.constant 0 : index
    %c0_6 = arith.constant 0 : index
    %4 = vector.load %arg4[%c0_4, %c0_5, %c0_6] : memref<1x16x256xf32, #tpu.memory_space<vmem>>, vector<1x16x256xf32>
    %5 = vector.shape_cast %4 : vector<1x16x256xf32> to vector<16x256xf32>
    %6 = vector.shape_cast %3 : vector<16x256xf32> to vector<1x16x256xf32>
    tpu.vector_store %arg4[%c0_4, %c0_5, %c0_6], %6 {strides = array<i32>} : memref<1x16x256xf32, #tpu.memory_space<vmem>>, vector<1x16x256xf32>,
    return
  }
  func.func @transform_0(%arg0: i32, %arg1: i32) -> (i32, i32, i32) {
    %c0_i32 = arith.constant 0 : i32
    %c0_i32_0 = arith.constant 0 : i32
    return %arg1, %arg0, %c0_i32 : i32, i32, i32
  }
  func.func @transform_1(%arg0: i32, %arg1: i32) -> (i32, i32) {
    %c0_i32 = arith.constant 0 : i32
    %c0_i32_0 = arith.constant 0 : i32
    return %arg0, %c0_i32 : i32, i32
  }
  func.func @transform_2(%arg0: i32, %arg1: i32) -> (i32, i32, i32) {
    %c0_i32 = arith.constant 0 : i32
    %c0_i32_0 = arith.constant 0 : i32
    return %arg1, %arg0, %c0_i32 : i32, i32, i32
  }
}

</mosaic_0001>

<bundles_post_ra>
// kernel: positional_encoding_forward.1
= control target key start
LH: loop header
LB: loop body
LE: loop exit
PB: predicated region body
PF: predicated region fallthrough
CT: control target
= control target key end

     0   :  { %7 = vsyncpa [#allocation3], 0  ;;  %s696_s0 = inlined_call_operand.hbm [shape: f32[2,16,256], index: 0, kind: input, shape index: {}]   ;;  %s697_s1 = inlined_call_operand.vmem [shape: f32[16,256], index: 1, kind: input, shape index: {}]   ;;  %s698_s2 = inlined_call_operand.hbm [shape: f32[2,16,256], index: 2, kind: output, shape index: {}]  }
   0x1   :  { %9 = vsyncpa [#allocation3 + $0x1], 0 }
   0x2   :  { %10 = vsyncpa [#allocation4], 0 }
   0x3   :  { %12 = vsyncpa [#allocation4 + $0x1], 0  ;;  %s564_s9 = smov 0   ;;  %s566_s10 = smov 0  }
   0x4   :  { %s568_s11 = smov 0   ;;  %s570_s12 = smov 0  }
   0x5   :  { %s572_s13 = smov 0   ;;  %s574_s14 = smov 0  }
   0x6 LB: > { %s347_s15 = sadd.s32 4294967295, %s543_s14   ;;  %s348_s16 = sadd.s32 4294967294, %s543_s14   ;;  %s543_s14 = sphi %s574_s14, %s18_s14   ;;  %s539_s13 = sphi %s572_s13, %s707_s13   ;;  %s535_s12 = sphi %s570_s12, %s706_s12   ;;  %s531_s11 = sphi %s568_s11, %s705_s11   ;;  %s527_s10 = sphi %s566_s10, %s704_s10   ;;  %s523_s9 = sphi %s564_s9, %s703_s9  }
   0x7   : > { %s27_s17 = sadd.s32 1, %s539_s13  ;;  %s39_s18 = sadd.s32 1, %s531_s11 }
   0x8   : > { %p28_p0 = scmp.ge.s32.totalorder %s27_s17, 2  ;;  %p46_p1 = scmp.ne.s32.totalorder %s531_s11, %s527_s10 }
   0x9   : > { %p47_p2 = scmp.eq.s32.totalorder %s543_s14, 0  ;;  %p52_p3 = scmp.ne.s32.totalorder %s527_s10, %s523_s9 }
   0xa   : > { %s709_s17 = smov (%p28_p0, %s27_s17), 0  ;;  %p53_p5 = scmp.eq.s32.totalorder %s347_s15, 0 }
   0xb   : > { %p605_p4 = por %p47_p2, %p46_p1  ;;  %s34_s20 = ssub.s32 %s539_s13, %s709_s17 }
   0xc   : > { %p104_p6 = scmp.eq.s32.totalorder %s347_s15, 1  ;;  %p37_p7 = scmp.eq.s32.totalorder %s34_s20, 0 }
   0xd   : > { %p611_p8 = por %p53_p5, %p52_p3  ;;  %p110_p10 = scmp.eq.s32.totalorder %s348_s16, 1 }
   0xe   : > { %p615_p9 = por %p104_p6, %p46_p1  ;;  %p351_p12 = scmp.ge.s32.totalorder %s543_s14, 2 }
   0xf   : > { %s620_s23 = scalar_select %p37_p7, %s531_s11, %s39_s18  }
  0x10   : > { %p622_p11 = por %p110_p10, %p52_p3  ;;  %p377_p13 = scmp.lt.s32.totalorder %s543_s14, 2 }
  0x11   : > { %s140_s25 = sand.u32 1, %s531_s11   ;;  %s363_s27 = sshll.u32 %s539_s13, 5 }
  0x12   : > { %s352_s26 = sshll.u32 %s140_s25, 5  ;;  %s152_s30 = scalar_lea.hbm %s696_s0, %s363_s27 }
  0x13   : > { %s144_s3 = scalar_lea.vmem [#allocation2], %s352_s26  ;;  %s153_s5 = sshll.u32 %s152_s30, 4  ;;  %s154_s5 = int_to_ptr.hbm [resolvable:$true] %s153_s5 }
  0x14   : > { %s155_s4 = sshll.u32 %s144_s3, 4  ;;  %p370_p0 = pnand %p377_p13, %p605_p4  ;;  %s156_s4 = int_to_ptr.vmem [resolvable:$true] %s155_s4 }
  0x15   : > { %p355_p1 = scmp.ge.s32.totalorder %s543_s14, 1  ;;  %s141_s6 = scalar_lea.sflag [#allocation3], %s140_s25 }
  0x16   : > { %s545_s7 = smov 256   ;;  %s546_s8 = smov 16  }
  0x17   : > { %372 = dma.hbm_to_vmem [thread:$0]  (!%p370_p0), %s154_s5, 512, %s156_s4, %s141_s6, %s545_s7, %s545_s7, %s546_s8  }
  0x18   : > { %p163_p2 = scmp.lt.s32.totalorder %s543_s14, 3 }
  0x1a   : > { %p164_p3 = pnand %p355_p1, %p163_p2 }
  0x1b   : > { %s638_s15 = sand.u32 (!%p164_p3), 1, %s527_s10  }
  0x1c   : > { %167 = sbr.rel (%p164_p3) target bundleno = 50 (0x32), region = 28  ;;  %s356_s16 = sshll.u32 (!%p164_p3), %s638_s15, 5 }
  0x1d   : > { %s170_s18 = scalar_lea.sflag (!%p164_p3), [#allocation3], %s638_s15  ;;  %s173_s20 = scalar_lea.vmem (!%p164_p3), [#allocation2], %s356_s16 }
  0x21   : > { %514 = dma.done.wait (%p611_p8), %s170_s18, 512  }
  0x22   : > { %516 = vsyncadd (%p611_p8), %s170_s18, 4294966784  ;;  %s364_s19 = sshll.u32 %s535_s12, 5  ;;  %v210_v0 = vld [vmem:[%s173_s20] sm:$0xff]  ;;  %s200_s30 = scalar_lea.vmem [#allocation5], %s356_s16  ;;  %v211_v2 = vld [vmem:[%s173_s20 + $0x8] sm:$0xff] }
  0x23   : > { %s241_s27 = scalar_lea.hbm %s698_s2, %s364_s19  ;;  %v214_v1 = vld [vmem:[%s697_s1] sm:$0xff]  ;;  %s242_s3 = sshll.u32 %s200_s30, 4  ;;  %v215_v4 = vld [vmem:[%s697_s1 + $0x8] sm:$0xff]  ;;  %v212_v5 = vld [vmem:[%s173_s20 + $0x10] sm:$0xff]  ;;  %s243_s3 = int_to_ptr.vmem [resolvable:$true] %s242_s3 }
  0x24   : > { %v218_v3 = vadd.f32 %v214_v1, %v210_v0  ;;  %v216_v6 = vld [vmem:[%s697_s1 + $0x10] sm:$0xff]  ;;  %s244_s6 = sshll.u32 %s241_s27, 4  ;;  %v219_v7 = vadd.f32 %v215_v4, %v211_v2  ;;  %v213_v9 = vld [vmem:[%s173_s20 + $0x18] sm:$0xff]  ;;  %s227_s16 = scalar_lea.sflag [#allocation4], %s638_s15  ;;  %s245_s6 = int_to_ptr.hbm [resolvable:$true] %s244_s6 }
  0x25   : > { %v220_v8 = vadd.f32 %v216_v6, %v212_v5  ;;  %v217_v10 = vld [vmem:[%s697_s1 + $0x18] sm:$0xff]  ;;  %s475_s18 = sshra.s32 %s245_s6, 4  ;;  %s481_s26 = scalar_lea.hbm %s698_s2, 64  ;;  %s476_s18 = int_to_ptr.hbm [resolvable:$true] %s475_s18 }
  0x26   : > { %222 = vst [vmem:[%s200_s30] sm:$0xff] %v218_v3  ;;  %v221_v11 = vadd.f32 %v217_v10, %v213_v9  ;;  %s477_s19 = scalar_lea.hbm %s476_s18, 32  ;;  %p482_p7 = scmp.lt.s32.totalorder %s476_s18, %s698_s2 }
  0x27   : > { %223 = vst [vmem:[%s200_s30 + $0x8] sm:$0xff] %v219_v7  ;;  %p478_p4 = scmp.ne.s32.totalorder %s476_s18, %s477_s19  ;;  %p483_p8 = scmp.lt.s32.totalorder %s481_s26, %s477_s19 }
  0x28   : > { %224 = vst [vmem:[%s200_s30 + $0x10] sm:$0xff] %v220_v8 }
  0x29   : > { %225 = vst [vmem:[%s200_s30 + $0x18] sm:$0xff] %v221_v11  ;;  %p479_p5 = pnand %p478_p4, %p615_p9  ;;  %p484_p10 = por %p483_p8, %p482_p7 }
  0x2b   : > { %p480_p6 = pneg %p479_p5 }
  0x2d   : > { %p485_p13 = pnand %p484_p10, %p480_p6 }
  0x2f   : > { %488 = shalt.err (!%p485_p13)
}
  0x30   : > { %s547_s15 = smov 256   ;;  %s548_s29 = smov 16  }
  0x31   : > { %367 = dma.vmem_to_hbm [thread:$0]  (%p615_p9), %s243_s3, 512, %s245_s6, %s227_s16, %s547_s15, %s547_s15, %s548_s29  }
  0x32 PF: > { %s259_s30 = sand.u32 1, %s523_s9   ;;  %p374_p0 = pnand %p351_p12, %p622_p11 }
  0x33   : > { %s260_s4 = scalar_lea.sflag [#allocation4], %s259_s30 }
  0x34   : > { %p375_p1 = pneg %p374_p0 }
  0x36   : > { %518 = dma.done.wait (%p375_p1), %s260_s4, 512  }
  0x37   : > { %520 = vsyncadd (%p375_p1), %s260_s4, 4294966784  ;;  %s18_s14 = sadd.s32 1, %s543_s14   ;;  %s703_s9 = smov %s527_s10 }
  0x38   : > { %p15_p2 = scmp.ge.s32.totalorder %s18_s14, 4   ;;  %s704_s10 = smov %s531_s11 }
  0x39   : > { %s705_s11 = smov %s620_s23  ;;  %s706_s12 = smov %s539_s13 }
  0x3a   : > { %s707_s13 = smov %s709_s17  ;;  %17 = sbr.rel (!%p15_p2) target bundleno = 6 (0x6), region = 76 }
  0x3f   :  { %266 = vsyncpa [#allocation3], 1 }
  0x40   :  { %268 = vsyncpa [#allocation3 + $0x1], 1 }
  0x41   :  { %269 = vsyncpa [#allocation4], 1 }
  0x42   :  { %271 = vsyncpa [#allocation4 + $0x1], 1 }

</bundles_post_ra>
